<compile_context>
chip_gen: v7x
topology: tpu7x:2x2x1
jax: 0.10.0
libtpu: 0.0.40
codegen_flags: <defaults>
</compile_context>

<pallas_src>
import jax
import jax.numpy as jnp
import numpy as np
from jax.experimental import pallas as pl
from jax.experimental.pallas import tpu as pltpu

B = 3          # batch of x2
R = 2          # rows per batch element (= linear out features)
D = 2          # linear in/out features, LSTM input size
H = 2          # LSTM hidden size
M = B * R      # flattened rows


def model_kernel(x_ref, p_ref, out_ref):
    # x_ref:  (6, 2)    x2 flattened to (B*R, D)
    # p_ref:  (7, 3, 2) unit k: rows 0,1 = transposed weight rows, row 2 = bias
    #                   unit 0 = linear; units 1-3 = lstm1 gates (i, g, o);
    #                   units 4-6 = lstm2 gates (i, g, o)
    X = x_ref[...]                                        # (6, 2)

    def cols(a):
        return a[:, 0:1], a[:, 1:2]

    def affine(c0, c1, k):
        # out[m, j] = c0[m]*u[0, j] + c1[m]*u[1, j] + u[2, j]   (pure VPU MACs)
        u = p_ref[k]                                      # (3, 2)
        return c0 * u[0:1, :] + c1 * u[1:2, :] + u[2:3, :]

    x0, x1 = cols(X)
    v1 = affine(x0, x1, 0)                                # linear(x2)   (6, 2)

    # v2 = permute(v1, (0, 2, 1)) flattened == within-pair row swap + column
    # parity select.  Build the pair-swapped v1 (swap[i] = v1[i ^ 1]) in-kernel
    # as a masked sum of broadcast rows — no transpose/reshape, no extra input.
    rows = jax.lax.broadcasted_iota(jnp.int32, (M, 1), 0)   # (6, 1)
    odd = (rows & 1) == 1
    swap = jnp.zeros_like(v1)
    for m in range(M):
        swap = swap + jnp.where(rows == (m ^ 1), v1[m:m + 1, :], 0.0)
    v2c0 = jnp.where(odd, swap[:, 1:2], v1[:, 0:1])
    v2c1 = jnp.where(odd, v1[:, 1:2], swap[:, 0:1])

    def lstm_cell(c0, c1, k0):
        # Zero initial state: h0 @ W_hh and f_gate * c0 are identically zero.
        i_g = jax.nn.sigmoid(affine(c0, c1, k0))          # input gate
        g_g = jnp.tanh(affine(c0, c1, k0 + 1))            # cell candidate
        o_g = jax.nn.sigmoid(affine(c0, c1, k0 + 2))      # output gate
        return o_g * jnp.tanh(i_g * g_g)                  # h'

    h1 = lstm_cell(v2c0, v2c1, 1)                         # v4   (6, 2)
    h1c0, h1c1 = cols(h1)
    h2 = lstm_cell(h1c0, h1c1, 4)                         # v5   (6, 2)

    out_ref[...] = v1 + h1 + h2                           # single whole-ref store


def pack_params(params):
    """One-time packing of every weight into a (7, 3, 2) slab (NOT per-call)."""
    (lin_w, lin_b, wih1, _whh1, bih1, bhh1, wih2, _whh2, bih2, bhh2) = params
    # _whh1/_whh2 never reach the kernel: with zero initial state they contribute 0.
    b1 = bih1 + bhh1
    b2 = bih2 + bhh2

    def unit(w, bias):            # w: (2,2) weight (out,in), bias: (2,)
        return jnp.concatenate([w.T, bias[None, :]], axis=0)   # (3, 2)

    units = [unit(lin_w, lin_b)]
    for wih, bb in ((wih1, b1), (wih2, b2)):
        for g in (0, 2, 3):       # i, g, o gates; f-gate dropped (c0 == 0)
            units.append(unit(wih[g * H:(g + 1) * H, :], bb[g * H:(g + 1) * H]))
    return jnp.stack(units).astype(jnp.float32)           # (7, 3, 2)


@jax.jit
def model_forward(x1, x2, pslab):
    del x1  # x1 is unused, exactly as in the PyTorch forward
    X = x2.reshape(M, D)          # contiguous reshape -> free bitcast, no launch
    out = pl.pallas_call(
        model_kernel,
        out_shape=jax.ShapeDtypeStruct((M, D), jnp.float32),
        in_specs=[pl.BlockSpec(memory_space=pltpu.MemorySpace.VMEM)] * 2,
        out_specs=pl.BlockSpec(memory_space=pltpu.MemorySpace.VMEM),
    )(X, pslab)
    return out.reshape(B, R, D)


def reference(x2, params):
    """Pure-JAX reference of the same interpretation (keeps the zero-state terms)."""
    lin_w, lin_b, wih1, whh1, bih1, bhh1, wih2, whh2, bih2, bhh2 = params
    v1 = jnp.einsum('brk,ik->bri', x2, lin_w) + lin_b
    v2 = jnp.transpose(v1, (0, 2, 1)).reshape(-1, D)

    def cell(x, wih, whh, bih, bhh):
        h0 = jnp.zeros_like(x)
        c0 = jnp.zeros_like(x)
        g = x @ wih.T + bih + h0 @ whh.T + bhh
        i_g, f_g, g_g, o_g = jnp.split(g, 4, axis=1)
        c = jax.nn.sigmoid(f_g) * c0 + jax.nn.sigmoid(i_g) * jnp.tanh(g_g)
        return jax.nn.sigmoid(o_g) * jnp.tanh(c)

    h1 = cell(v2, wih1, whh1, bih1, bhh1)
    h2 = cell(h1, wih2, whh2, bih2, bhh2)
    return v1 + h1.reshape(B, R, D) + h2.reshape(B, R, D)


def init_params(key):
    ks = jax.random.split(key, 10)
    k_lin = 1.0 / np.sqrt(D)
    k_lstm = 1.0 / np.sqrt(H)
    u = lambda k, shape, bound: jax.random.uniform(
        k, shape, jnp.float32, minval=-bound, maxval=bound)
    lin_w = u(ks[0], (D, D), k_lin)
    lin_b = u(ks[1], (D,), k_lin)
    wih1 = u(ks[2], (4 * H, D), k_lstm)
    whh1 = u(ks[3], (4 * H, H), k_lstm)
    bih1 = u(ks[4], (4 * H,), k_lstm)
    bhh1 = u(ks[5], (4 * H,), k_lstm)
    wih2 = u(ks[6], (4 * H, H), k_lstm)
    whh2 = u(ks[7], (4 * H, H), k_lstm)
    bih2 = u(ks[8], (4 * H,), k_lstm)
    bhh2 = u(ks[9], (4 * H,), k_lstm)
    return (lin_w, lin_b, wih1, whh1, bih1, bhh1, wih2, whh2, bih2, bhh2)


if __name__ == "__main__":
    key = jax.random.PRNGKey(0)
    k_p, k_x1, k_x2 = jax.random.split(key, 3)
    params = init_params(k_p)
    pslab = pack_params(params)          # packed ONCE, never inside the hot path
    x1 = jax.random.normal(k_x1, (B, R, D), jnp.float32)   # unused by forward
    x2 = jax.random.normal(k_x2, (B, R, D), jnp.float32)

    out = model_forward(x1, x2, pslab)
    out = jax.block_until_ready(out)

    ref = reference(x2, params)
    np.testing.assert_allclose(np.asarray(out), np.asarray(ref),
                               rtol=1e-5, atol=1e-5)
    print("KERNEL_OK")
</pallas_src>

<mosaic_0001>
module attributes {stable_mosaic.version = 11 : i64} {
  func.func @model_kernel(%arg0: memref<6x2xf32, #tpu.memory_space<vmem>>, %arg1: memref<7x3x2xf32, #tpu.memory_space<vmem>>, %arg2: memref<6x2xf32, #tpu.memory_space<vmem>>) attributes {dimension_semantics = [], scalar_prefetch = 0 : i64, scratch_operands = 0 : i64, tpu.core_type = #tpu.core_type<tc>} {
    %c0 = arith.constant 0 : index
    %c0_0 = arith.constant 0 : index
    %0 = vector.load %arg0[%c0, %c0_0] : memref<6x2xf32, #tpu.memory_space<vmem>>, vector<6x2xf32>
    %1 = vector.extract_strided_slice %0 {offsets = [0, 0], sizes = [6, 1], strides = [1, 1]} : vector<6x2xf32> to vector<6x1xf32>
    %2 = vector.extract_strided_slice %0 {offsets = [0, 1], sizes = [6, 1], strides = [1, 1]} : vector<6x2xf32> to vector<6x1xf32>
    %c0_1 = arith.constant 0 : index
    %c0_2 = arith.constant 0 : index
    %c0_3 = arith.constant 0 : index
    %3 = vector.load %arg1[%c0_1, %c0_2, %c0_3] : memref<7x3x2xf32, #tpu.memory_space<vmem>>, vector<1x3x2xf32>
    %4 = vector.shape_cast %3 : vector<1x3x2xf32> to vector<3x2xf32>
    %5 = vector.extract_strided_slice %4 {offsets = [0, 0], sizes = [1, 2], strides = [1, 1]} : vector<3x2xf32> to vector<1x2xf32>
    %6 = vector.broadcast %1 : vector<6x1xf32> to vector<6x2xf32>
    %7 = vector.broadcast %5 : vector<1x2xf32> to vector<6x2xf32>
    %8 = arith.mulf %6, %7 : vector<6x2xf32>
    %9 = vector.extract_strided_slice %4 {offsets = [1, 0], sizes = [1, 2], strides = [1, 1]} : vector<3x2xf32> to vector<1x2xf32>
    %10 = vector.broadcast %2 : vector<6x1xf32> to vector<6x2xf32>
    %11 = vector.broadcast %9 : vector<1x2xf32> to vector<6x2xf32>
    %12 = arith.mulf %10, %11 : vector<6x2xf32>
    %13 = arith.addf %8, %12 : vector<6x2xf32>
    %14 = vector.extract_strided_slice %4 {offsets = [2, 0], sizes = [1, 2], strides = [1, 1]} : vector<3x2xf32> to vector<1x2xf32>
    %15 = vector.broadcast %14 : vector<1x2xf32> to vector<6x2xf32>
    %16 = arith.addf %13, %15 : vector<6x2xf32>
    %17 = tpu.iota {dimensions = array<i32: 0>} : vector<6x1xi32>
    %c1_i32 = arith.constant 1 : i32
    %18 = vector.broadcast %c1_i32 : i32 to vector<6x1xi32>
    %19 = arith.andi %17, %18 : vector<6x1xi32>
    %c1_i32_4 = arith.constant 1 : i32
    %20 = vector.broadcast %c1_i32_4 : i32 to vector<6x1xi32>
    %21 = arith.cmpi eq, %19, %20 : vector<6x1xi32>
    %cst = arith.constant 0.000000e+00 : f32
    %22 = vector.broadcast %cst : f32 to vector<6x2xf32>
    %c1_i32_5 = arith.constant 1 : i32
    %23 = vector.broadcast %c1_i32_5 : i32 to vector<6x1xi32>
    %24 = arith.cmpi eq, %17, %23 : vector<6x1xi32>
    %25 = vector.extract_strided_slice %16 {offsets = [0, 0], sizes = [1, 2], strides = [1, 1]} : vector<6x2xf32> to vector<1x2xf32>
    %cst_6 = arith.constant 0.000000e+00 : f32
    %26 = vector.shape_cast %24 : vector<6x1xi1> to vector<6x1xi1>
    %27 = vector.broadcast %26 : vector<6x1xi1> to vector<6x2xi1>
    %28 = vector.shape_cast %25 : vector<1x2xf32> to vector<1x2xf32>
    %29 = vector.broadcast %28 : vector<1x2xf32> to vector<6x2xf32>
    %30 = vector.broadcast %cst_6 : f32 to vector<6x2xf32>
    %31 = arith.select %27, %29, %30 : vector<6x2xi1>, vector<6x2xf32>
    %32 = arith.addf %22, %31 : vector<6x2xf32>
    %c0_i32 = arith.constant 0 : i32
    %33 = vector.broadcast %c0_i32 : i32 to vector<6x1xi32>
    %34 = arith.cmpi eq, %17, %33 : vector<6x1xi32>
    %35 = vector.extract_strided_slice %16 {offsets = [1, 0], sizes = [1, 2], strides = [1, 1]} : vector<6x2xf32> to vector<1x2xf32>
    %cst_7 = arith.constant 0.000000e+00 : f32
    %36 = vector.shape_cast %34 : vector<6x1xi1> to vector<6x1xi1>
    %37 = vector.broadcast %36 : vector<6x1xi1> to vector<6x2xi1>
    %38 = vector.shape_cast %35 : vector<1x2xf32> to vector<1x2xf32>
    %39 = vector.broadcast %38 : vector<1x2xf32> to vector<6x2xf32>
    %40 = vector.broadcast %cst_7 : f32 to vector<6x2xf32>
    %41 = arith.select %37, %39, %40 : vector<6x2xi1>, vector<6x2xf32>
    %42 = arith.addf %32, %41 : vector<6x2xf32>
    %c3_i32 = arith.constant 3 : i32
    %43 = vector.broadcast %c3_i32 : i32 to vector<6x1xi32>
    %44 = arith.cmpi eq, %17, %43 : vector<6x1xi32>
    %45 = vector.extract_strided_slice %16 {offsets = [2, 0], sizes = [1, 2], strides = [1, 1]} : vector<6x2xf32> to vector<1x2xf32>
    %cst_8 = arith.constant 0.000000e+00 : f32
    %46 = vector.shape_cast %44 : vector<6x1xi1> to vector<6x1xi1>
    %47 = vector.broadcast %46 : vector<6x1xi1> to vector<6x2xi1>
    %48 = vector.shape_cast %45 : vector<1x2xf32> to vector<1x2xf32>
    %49 = vector.broadcast %48 : vector<1x2xf32> to vector<6x2xf32>
    %50 = vector.broadcast %cst_8 : f32 to vector<6x2xf32>
    %51 = arith.select %47, %49, %50 : vector<6x2xi1>, vector<6x2xf32>
    %52 = arith.addf %42, %51 : vector<6x2xf32>
    %c2_i32 = arith.constant 2 : i32
    %53 = vector.broadcast %c2_i32 : i32 to vector<6x1xi32>
    %54 = arith.cmpi eq, %17, %53 : vector<6x1xi32>
    %55 = vector.extract_strided_slice %16 {offsets = [3, 0], sizes = [1, 2], strides = [1, 1]} : vector<6x2xf32> to vector<1x2xf32>
    %cst_9 = arith.constant 0.000000e+00 : f32
    %56 = vector.shape_cast %54 : vector<6x1xi1> to vector<6x1xi1>
    %57 = vector.broadcast %56 : vector<6x1xi1> to vector<6x2xi1>
    %58 = vector.shape_cast %55 : vector<1x2xf32> to vector<1x2xf32>
    %59 = vector.broadcast %58 : vector<1x2xf32> to vector<6x2xf32>
    %60 = vector.broadcast %cst_9 : f32 to vector<6x2xf32>
    %61 = arith.select %57, %59, %60 : vector<6x2xi1>, vector<6x2xf32>
    %62 = arith.addf %52, %61 : vector<6x2xf32>
    %c5_i32 = arith.constant 5 : i32
    %63 = vector.broadcast %c5_i32 : i32 to vector<6x1xi32>
    %64 = arith.cmpi eq, %17, %63 : vector<6x1xi32>
    %65 = vector.extract_strided_slice %16 {offsets = [4, 0], sizes = [1, 2], strides = [1, 1]} : vector<6x2xf32> to vector<1x2xf32>
    %cst_10 = arith.constant 0.000000e+00 : f32
    %66 = vector.shape_cast %64 : vector<6x1xi1> to vector<6x1xi1>
    %67 = vector.broadcast %66 : vector<6x1xi1> to vector<6x2xi1>
    %68 = vector.shape_cast %65 : vector<1x2xf32> to vector<1x2xf32>
    %69 = vector.broadcast %68 : vector<1x2xf32> to vector<6x2xf32>
    %70 = vector.broadcast %cst_10 : f32 to vector<6x2xf32>
    %71 = arith.select %67, %69, %70 : vector<6x2xi1>, vector<6x2xf32>
    %72 = arith.addf %62, %71 : vector<6x2xf32>
    %c4_i32 = arith.constant 4 : i32
    %73 = vector.broadcast %c4_i32 : i32 to vector<6x1xi32>
    %74 = arith.cmpi eq, %17, %73 : vector<6x1xi32>
    %75 = vector.extract_strided_slice %16 {offsets = [5, 0], sizes = [1, 2], strides = [1, 1]} : vector<6x2xf32> to vector<1x2xf32>
    %cst_11 = arith.constant 0.000000e+00 : f32
    %76 = vector.shape_cast %74 : vector<6x1xi1> to vector<6x1xi1>
    %77 = vector.broadcast %76 : vector<6x1xi1> to vector<6x2xi1>
    %78 = vector.shape_cast %75 : vector<1x2xf32> to vector<1x2xf32>
    %79 = vector.broadcast %78 : vector<1x2xf32> to vector<6x2xf32>
    %80 = vector.broadcast %cst_11 : f32 to vector<6x2xf32>
    %81 = arith.select %77, %79, %80 : vector<6x2xi1>, vector<6x2xf32>
    %82 = arith.addf %72, %81 : vector<6x2xf32>
    %83 = vector.extract_strided_slice %82 {offsets = [0, 1], sizes = [6, 1], strides = [1, 1]} : vector<6x2xf32> to vector<6x1xf32>
    %84 = vector.extract_strided_slice %16 {offsets = [0, 0], sizes = [6, 1], strides = [1, 1]} : vector<6x2xf32> to vector<6x1xf32>
    %85 = arith.select %21, %83, %84 : vector<6x1xi1>, vector<6x1xf32>
    %86 = vector.extract_strided_slice %16 {offsets = [0, 1], sizes = [6, 1], strides = [1, 1]} : vector<6x2xf32> to vector<6x1xf32>
    %87 = vector.extract_strided_slice %82 {offsets = [0, 0], sizes = [6, 1], strides = [1, 1]} : vector<6x2xf32> to vector<6x1xf32>
    %88 = arith.select %21, %86, %87 : vector<6x1xi1>, vector<6x1xf32>
    %c1 = arith.constant 1 : index
    %c0_12 = arith.constant 0 : index
    %c0_13 = arith.constant 0 : index
    %89 = vector.load %arg1[%c1, %c0_12, %c0_13] : memref<7x3x2xf32, #tpu.memory_space<vmem>>, vector<1x3x2xf32>
    %90 = vector.shape_cast %89 : vector<1x3x2xf32> to vector<3x2xf32>
    %91 = vector.extract_strided_slice %90 {offsets = [0, 0], sizes = [1, 2], strides = [1, 1]} : vector<3x2xf32> to vector<1x2xf32>
    %92 = vector.broadcast %85 : vector<6x1xf32> to vector<6x2xf32>
    %93 = vector.broadcast %91 : vector<1x2xf32> to vector<6x2xf32>
    %94 = arith.mulf %92, %93 : vector<6x2xf32>
    %95 = vector.extract_strided_slice %90 {offsets = [1, 0], sizes = [1, 2], strides = [1, 1]} : vector<3x2xf32> to vector<1x2xf32>
    %96 = vector.broadcast %88 : vector<6x1xf32> to vector<6x2xf32>
    %97 = vector.broadcast %95 : vector<1x2xf32> to vector<6x2xf32>
    %98 = arith.mulf %96, %97 : vector<6x2xf32>
    %99 = arith.addf %94, %98 : vector<6x2xf32>
    %100 = vector.extract_strided_slice %90 {offsets = [2, 0], sizes = [1, 2], strides = [1, 1]} : vector<3x2xf32> to vector<1x2xf32>
    %101 = vector.broadcast %100 : vector<1x2xf32> to vector<6x2xf32>
    %102 = arith.addf %99, %101 : vector<6x2xf32>
    %103 = arith.negf %102 : vector<6x2xf32>
    %104 = math.exp %103 : vector<6x2xf32>
    %cst_14 = arith.constant 1.000000e+00 : f32
    %105 = vector.broadcast %cst_14 : f32 to vector<6x2xf32>
    %106 = arith.addf %105, %104 : vector<6x2xf32>
    %107 = arith.divf %105, %106 : vector<6x2xf32>
    %c2 = arith.constant 2 : index
    %c0_15 = arith.constant 0 : index
    %c0_16 = arith.constant 0 : index
    %108 = vector.load %arg1[%c2, %c0_15, %c0_16] : memref<7x3x2xf32, #tpu.memory_space<vmem>>, vector<1x3x2xf32>
    %109 = vector.shape_cast %108 : vector<1x3x2xf32> to vector<3x2xf32>
    %110 = vector.extract_strided_slice %109 {offsets = [0, 0], sizes = [1, 2], strides = [1, 1]} : vector<3x2xf32> to vector<1x2xf32>
    %111 = vector.broadcast %85 : vector<6x1xf32> to vector<6x2xf32>
    %112 = vector.broadcast %110 : vector<1x2xf32> to vector<6x2xf32>
    %113 = arith.mulf %111, %112 : vector<6x2xf32>
    %114 = vector.extract_strided_slice %109 {offsets = [1, 0], sizes = [1, 2], strides = [1, 1]} : vector<3x2xf32> to vector<1x2xf32>
    %115 = vector.broadcast %88 : vector<6x1xf32> to vector<6x2xf32>
    %116 = vector.broadcast %114 : vector<1x2xf32> to vector<6x2xf32>
    %117 = arith.mulf %115, %116 : vector<6x2xf32>
    %118 = arith.addf %113, %117 : vector<6x2xf32>
    %119 = vector.extract_strided_slice %109 {offsets = [2, 0], sizes = [1, 2], strides = [1, 1]} : vector<3x2xf32> to vector<1x2xf32>
    %120 = vector.broadcast %119 : vector<1x2xf32> to vector<6x2xf32>
    %121 = arith.addf %118, %120 : vector<6x2xf32>
    %122 = math.tanh %121 : vector<6x2xf32>
    %c3 = arith.constant 3 : index
    %c0_17 = arith.constant 0 : index
    %c0_18 = arith.constant 0 : index
    %123 = vector.load %arg1[%c3, %c0_17, %c0_18] : memref<7x3x2xf32, #tpu.memory_space<vmem>>, vector<1x3x2xf32>
    %124 = vector.shape_cast %123 : vector<1x3x2xf32> to vector<3x2xf32>
    %125 = vector.extract_strided_slice %124 {offsets = [0, 0], sizes = [1, 2], strides = [1, 1]} : vector<3x2xf32> to vector<1x2xf32>
    %126 = vector.broadcast %85 : vector<6x1xf32> to vector<6x2xf32>
    %127 = vector.broadcast %125 : vector<1x2xf32> to vector<6x2xf32>
    %128 = arith.mulf %126, %127 : vector<6x2xf32>
    %129 = vector.extract_strided_slice %124 {offsets = [1, 0], sizes = [1, 2], strides = [1, 1]} : vector<3x2xf32> to vector<1x2xf32>
    %130 = vector.broadcast %88 : vector<6x1xf32> to vector<6x2xf32>
    %131 = vector.broadcast %129 : vector<1x2xf32> to vector<6x2xf32>
    %132 = arith.mulf %130, %131 : vector<6x2xf32>
    %133 = arith.addf %128, %132 : vector<6x2xf32>
    %134 = vector.extract_strided_slice %124 {offsets = [2, 0], sizes = [1, 2], strides = [1, 1]} : vector<3x2xf32> to vector<1x2xf32>
    %135 = vector.broadcast %134 : vector<1x2xf32> to vector<6x2xf32>
    %136 = arith.addf %133, %135 : vector<6x2xf32>
    %137 = arith.negf %136 : vector<6x2xf32>
    %138 = math.exp %137 : vector<6x2xf32>
    %cst_19 = arith.constant 1.000000e+00 : f32
    %139 = vector.broadcast %cst_19 : f32 to vector<6x2xf32>
    %140 = arith.addf %139, %138 : vector<6x2xf32>
    %141 = arith.divf %139, %140 : vector<6x2xf32>
    %142 = arith.mulf %107, %122 : vector<6x2xf32>
    %143 = math.tanh %142 : vector<6x2xf32>
    %144 = arith.mulf %141, %143 : vector<6x2xf32>
    %145 = vector.extract_strided_slice %144 {offsets = [0, 0], sizes = [6, 1], strides = [1, 1]} : vector<6x2xf32> to vector<6x1xf32>
    %146 = vector.extract_strided_slice %144 {offsets = [0, 1], sizes = [6, 1], strides = [1, 1]} : vector<6x2xf32> to vector<6x1xf32>
    %c4 = arith.constant 4 : index
    %c0_20 = arith.constant 0 : index
    %c0_21 = arith.constant 0 : index
    %147 = vector.load %arg1[%c4, %c0_20, %c0_21] : memref<7x3x2xf32, #tpu.memory_space<vmem>>, vector<1x3x2xf32>
    %148 = vector.shape_cast %147 : vector<1x3x2xf32> to vector<3x2xf32>
    %149 = vector.extract_strided_slice %148 {offsets = [0, 0], sizes = [1, 2], strides = [1, 1]} : vector<3x2xf32> to vector<1x2xf32>
    %150 = vector.broadcast %145 : vector<6x1xf32> to vector<6x2xf32>
    %151 = vector.broadcast %149 : vector<1x2xf32> to vector<6x2xf32>
    %152 = arith.mulf %150, %151 : vector<6x2xf32>
    %153 = vector.extract_strided_slice %148 {offsets = [1, 0], sizes = [1, 2], strides = [1, 1]} : vector<3x2xf32> to vector<1x2xf32>
    %154 = vector.broadcast %146 : vector<6x1xf32> to vector<6x2xf32>
    %155 = vector.broadcast %153 : vector<1x2xf32> to vector<6x2xf32>
    %156 = arith.mulf %154, %155 : vector<6x2xf32>
    %157 = arith.addf %152, %156 : vector<6x2xf32>
    %158 = vector.extract_strided_slice %148 {offsets = [2, 0], sizes = [1, 2], strides = [1, 1]} : vector<3x2xf32> to vector<1x2xf32>
    %159 = vector.broadcast %158 : vector<1x2xf32> to vector<6x2xf32>
    %160 = arith.addf %157, %159 : vector<6x2xf32>
    %161 = arith.negf %160 : vector<6x2xf32>
    %162 = math.exp %161 : vector<6x2xf32>
    %cst_22 = arith.constant 1.000000e+00 : f32
    %163 = vector.broadcast %cst_22 : f32 to vector<6x2xf32>
    %164 = arith.addf %163, %162 : vector<6x2xf32>
    %165 = arith.divf %163, %164 : vector<6x2xf32>
    %c5 = arith.constant 5 : index
    %c0_23 = arith.constant 0 : index
    %c0_24 = arith.constant 0 : index
    %166 = vector.load %arg1[%c5, %c0_23, %c0_24] : memref<7x3x2xf32, #tpu.memory_space<vmem>>, vector<1x3x2xf32>
    %167 = vector.shape_cast %166 : vector<1x3x2xf32> to vector<3x2xf32>
    %168 = vector.extract_strided_slice %167 {offsets = [0, 0], sizes = [1, 2], strides = [1, 1]} : vector<3x2xf32> to vector<1x2xf32>
    %169 = vector.broadcast %145 : vector<6x1xf32> to vector<6x2xf32>
    %170 = vector.broadcast %168 : vector<1x2xf32> to vector<6x2xf32>
    %171 = arith.mulf %169, %170 : vector<6x2xf32>
    %172 = vector.extract_strided_slice %167 {offsets = [1, 0], sizes = [1, 2], strides = [1, 1]} : vector<3x2xf32> to vector<1x2xf32>
    %173 = vector.broadcast %146 : vector<6x1xf32> to vector<6x2xf32>
    %174 = vector.broadcast %172 : vector<1x2xf32> to vector<6x2xf32>
    %175 = arith.mulf %173, %174 : vector<6x2xf32>
    %176 = arith.addf %171, %175 : vector<6x2xf32>
    %177 = vector.extract_strided_slice %167 {offsets = [2, 0], sizes = [1, 2], strides = [1, 1]} : vector<3x2xf32> to vector<1x2xf32>
    %178 = vector.broadcast %177 : vector<1x2xf32> to vector<6x2xf32>
    %179 = arith.addf %176, %178 : vector<6x2xf32>
    %180 = math.tanh %179 : vector<6x2xf32>
    %c6 = arith.constant 6 : index
    %c0_25 = arith.constant 0 : index
    %c0_26 = arith.constant 0 : index
    %181 = vector.load %arg1[%c6, %c0_25, %c0_26] : memref<7x3x2xf32, #tpu.memory_space<vmem>>, vector<1x3x2xf32>
    %182 = vector.shape_cast %181 : vector<1x3x2xf32> to vector<3x2xf32>
    %183 = vector.extract_strided_slice %182 {offsets = [0, 0], sizes = [1, 2], strides = [1, 1]} : vector<3x2xf32> to vector<1x2xf32>
    %184 = vector.broadcast %145 : vector<6x1xf32> to vector<6x2xf32>
    %185 = vector.broadcast %183 : vector<1x2xf32> to vector<6x2xf32>
    %186 = arith.mulf %184, %185 : vector<6x2xf32>
    %187 = vector.extract_strided_slice %182 {offsets = [1, 0], sizes = [1, 2], strides = [1, 1]} : vector<3x2xf32> to vector<1x2xf32>
    %188 = vector.broadcast %146 : vector<6x1xf32> to vector<6x2xf32>
    %189 = vector.broadcast %187 : vector<1x2xf32> to vector<6x2xf32>
    %190 = arith.mulf %188, %189 : vector<6x2xf32>
    %191 = arith.addf %186, %190 : vector<6x2xf32>
    %192 = vector.extract_strided_slice %182 {offsets = [2, 0], sizes = [1, 2], strides = [1, 1]} : vector<3x2xf32> to vector<1x2xf32>
    %193 = vector.broadcast %192 : vector<1x2xf32> to vector<6x2xf32>
    %194 = arith.addf %191, %193 : vector<6x2xf32>
    %195 = arith.negf %194 : vector<6x2xf32>
    %196 = math.exp %195 : vector<6x2xf32>
    %cst_27 = arith.constant 1.000000e+00 : f32
    %197 = vector.broadcast %cst_27 : f32 to vector<6x2xf32>
    %198 = arith.addf %197, %196 : vector<6x2xf32>
    %199 = arith.divf %197, %198 : vector<6x2xf32>
    %200 = arith.mulf %165, %180 : vector<6x2xf32>
    %201 = math.tanh %200 : vector<6x2xf32>
    %202 = arith.mulf %199, %201 : vector<6x2xf32>
    %203 = arith.addf %16, %144 : vector<6x2xf32>
    %204 = arith.addf %203, %202 : vector<6x2xf32>
    %c0_28 = arith.constant 0 : index
    %c0_29 = arith.constant 0 : index
    %205 = vector.load %arg2[%c0_28, %c0_29] : memref<6x2xf32, #tpu.memory_space<vmem>>, vector<6x2xf32>
    tpu.vector_store %arg2[%c0_28, %c0_29], %204 {strides = array<i32>} : memref<6x2xf32, #tpu.memory_space<vmem>>, vector<6x2xf32>,
    return
  }
}

</mosaic_0001>

<bundles_post_ra>
// kernel: model_forward.1
= control target key start
LH: loop header
LB: loop body
LE: loop exit
PB: predicated region body
PF: predicated region fallthrough
CT: control target
= control target key end

     0   :  { %v314_v0 = vmov 0   ;;  %v315_v2 = vmov 1   ;;  %v18_v3 = vlaneseq  ;;  %vm267_vm7 = vcmask 13312   ;;  %s400_s0 = inlined_call_operand.vmem [shape: f32[6,2], index: 0, kind: input, shape index: {}]   ;;  %s401_s1 = inlined_call_operand.vmem [shape: f32[7,3,2], index: 1, kind: input, shape index: {}]   ;;  %s402_s2 = inlined_call_operand.vmem [shape: f32[6,2], index: 2, kind: output, shape index: {}]  }
   0x1   :  { %286 = vset.pattern.permute.xlu0 %v314_v0  ;;  %v11_v1 = vld [vmem:[%s400_s0] sm:$0x3f]  ;;  %288 = vset.pattern.permute.xlu1 %v315_v2  ;;  %s316_s0 = smov 1   ;;  %v276_v44 = vld [vmem:[%s401_s1 + $0xc] sm:$0x7] }
   0x2   :  { %15 = vperm.xlu0 %286, %v11_v1   ;;  %v19_v4 = vshrl.u32 %v18_v3, 7  ;;  %v12_v7 = vld [vmem:[%s401_s1] sm:$0x7]  ;;  %v273_v43 = vld [vmem:[%s401_s1 + $0x4] sm:$0x7] }
   0x3   :  { %v275_v57 = vld [vmem:[%s401_s1 + $0x8] sm:$0x7] }
   0x4   :  { %v335_v5 = vsub.s32 0, %v19_v4  ;;  %v337_v6 = vsub.s32 1, %v19_v4  ;;  %v344_v11 = vsub.s32 2, %v19_v4  ;;  %v74_v18 = vsub.s32 3, %v19_v4 }
   0x5   :  { %vm42_vm0 = vcmp.eq.s32.totalorder %v19_v4, 1  ;;  %vm51_vm1 = vcmp.eq.s32.totalorder %v19_v4, 0  ;;  %v83_v22 = vsub.s32 4, %v19_v4  ;;  %vm60_vm2 = vcmp.eq.s32.totalorder %v19_v4, 3 }
   0x6   :  { %287 = vset.pattern.permute.xlu0 %v315_v2  ;;  %v21_v9 = vrot.slane %v12_v7, %v335_v5  ;;  %v30_v10 = vrot.slane %v12_v7, %v337_v6  ;;  %v36_v14 = vrot.slane %v12_v7, %v344_v11  ;;  %v92_v26 = vsub.s32 5, %v19_v4 }
   0x7   :  { %24 = vperm.xlu0 %287, %v11_v1   ;;  %vm69_vm3 = vcmp.eq.s32.totalorder %v19_v4, 2  ;;  %vm78_vm4 = vcmp.eq.s32.totalorder %v19_v4, 5  ;;  %vm87_vm5 = vcmp.eq.s32.totalorder %v19_v4, 4  ;;  %v40_v38 = vand.u32 1, %v19_v4 }
   0x8   :  { %v116_v45 = vrot.slane %v273_v43, %v335_v5  ;;  %v126_v46 = vrot.slane %v273_v43, %v337_v6  ;;  %v169_v47 = vrot.slane %v276_v44, %v337_v6  ;;  %v164_v49 = vrot.slane %v276_v44, %v335_v5 }
   0x9   :  { %vm41_vm6 = vcmp.eq.s32.totalorder %v40_v38, 1  ;;  %v132_v52 = vrot.slane %v273_v43, %v344_v11  ;;  %v150_v58 = vrot.slane %v275_v57, %v337_v6  ;;  %v175_v59 = vrot.slane %v276_v44, %v344_v11 }
   0xa   :  { %v145_v62 = vrot.slane %v275_v57, %v335_v5  ;;  %v156_v3 = vrot.slane %v275_v57, %v344_v11 }
  0x81   :  { %v16_v8 = vpop.permute.xlu0 %15 }
  0x82   :  { %v22_v13 = vmul.f32 %v21_v9, %v16_v8 }
  0x86   :  { %v25_v12 = vpop.permute.xlu0 %24 }
  0x87   :  { %v31_v15 = vmul.f32 %v30_v10, %v25_v12 }
  0x89   :  { %v32_v16 = vadd.f32 %v31_v15, %v22_v13 }
  0x8b   :  { %v347_v17 = vadd.f32 %v36_v14, %v32_v16 }
  0x8d   :  { %97 = vrot.lane.b32.xlu1 %v347_v17, %s316_s0  ;;  %v48_v19 = vrot.slane %v347_v17, %v335_v5  ;;  %v57_v20 = vrot.slane %v347_v17, %v337_v6  ;;  %v66_v21 = vrot.slane %v347_v17, %v344_v11  ;;  %v75_v25 = vrot.slane %v347_v17, %v74_v18 }
  0x8e   :  { %v84_v29 = vrot.slane %v347_v17, %v83_v22  ;;  %v93_v32 = vrot.slane %v347_v17, %v92_v26  ;;  %v281_v22 = vld [vmem:[%s401_s1 + $0x18] sm:$0x7] }
  0x8f   :  { %v49_v23 = vsel %vm42_vm0, %v48_v19, 0.0  ;;  %v58_v24 = vsel %vm51_vm1, %v57_v20, 0.0  ;;  %v67_v28 = vsel %vm60_vm2, %v66_v21, 0.0  ;;  %v76_v31 = vsel %vm69_vm3, %v75_v25, 0.0  ;;  %v278_v21 = vld [vmem:[%s401_s1 + $0x10] sm:$0x7] }
  0x90   :  { %v59_v27 = vadd.f32 %v58_v24, %v49_v23  ;;  %v85_v34 = vsel %vm78_vm4, %v84_v29, 0.0  ;;  %v94_v36 = vsel %vm87_vm5, %v93_v32, 0.0  ;;  %v205_v23 = vrot.slane %v278_v21, %v337_v6  ;;  %v280_v29 = vld [vmem:[%s401_s1 + $0x14] sm:$0x7] }
  0x91   :  { %v248_v24 = vrot.slane %v281_v22, %v337_v6  ;;  %v196_v25 = vrot.slane %v278_v21, %v335_v5  ;;  %v243_v26 = vrot.slane %v281_v22, %v335_v5  ;;  %v211_v32 = vrot.slane %v278_v21, %v344_v11 }
  0x92   :  { %v68_v30 = vadd.f32 %v67_v28, %v59_v27  ;;  %v254_v38 = vrot.slane %v281_v22, %v344_v11 }
  0x94   :  { %v77_v33 = vadd.f32 %v76_v31, %v68_v30 }
  0x96   :  { %v86_v35 = vadd.f32 %v85_v34, %v77_v33 }
  0x98   :  { %v95_v37 = vadd.f32 %v94_v36, %v86_v35  ;;  %v229_v36 = vrot.slane %v280_v29, %v337_v6 }
  0x9a   :  { %102 = vrot.lane.b32.xlu1 %v95_v37, %s316_s0 }
  0xff   :  { %v98_v39 = vpop.permute.xlu1 %97 }
 0x100   :  { %v100_v40 = vsel %vm41_vm6, %v95_v37, %v98_v39  ;;  %v224_v37 = vrot.slane %v280_v29, %v335_v5 }
 0x101   :  { %110 = vperm.xlu1 %288, %v100_v40  }
 0x105   :  { %289 = vset.pattern.permute.xlu1 %v314_v0 }
 0x10c   :  { %v103_v41 = vpop.permute.xlu1 %102 }
 0x10d   :  { %v105_v42 = vsel %vm41_vm6, %v347_v17, %v103_v41 }
 0x10e   :  { %120 = vperm.xlu0 %287, %v105_v42  }
 0x180   :  { %v111_v48 = vpop.permute.xlu1 %110 }
 0x181   :  { %v117_v51 = vmul.f32 %v116_v45, %v111_v48  ;;  %v165_v55 = vmul.f32 %v164_v49, %v111_v48  ;;  %v146_v2 = vmul.f32 %v145_v62, %v111_v48  ;;  %v235_v45 = vrot.slane %v280_v29, %v344_v11 }
 0x18d   :  { %v121_v50 = vpop.permute.xlu0 %120 }
 0x18e   :  { %v127_v53 = vmul.f32 %v126_v46, %v121_v50  ;;  %v170_v54 = vmul.f32 %v169_v47, %v121_v50  ;;  %v151_v0 = vmul.f32 %v150_v58, %v121_v50 }
 0x190   :  { %v128_v56 = vadd.f32 %v127_v53, %v117_v51  ;;  %v171_v61 = vadd.f32 %v170_v54, %v165_v55  ;;  %v152_v4 = vadd.f32 %v151_v0, %v146_v2 }
 0x192   :  { %v133_v60 = vadd.f32 %v132_v52, %v128_v56  ;;  %v176_v1 = vadd.f32 %v175_v59, %v171_v61  ;;  %v157_v8 = vadd.f32 %v156_v3, %v152_v4 }
 0x194   :  { %v274_v63 = vmul.f32 -1.442695, %v133_v60  ;;  %v277_v7 = vmul.f32 -1.442695, %v176_v1 }
 0x196   :  { %290 = vpow2.f32 %v274_v63 }
 0x197   :  { %292 = vpow2.f32 %v277_v7 }
 0x198   :  { %294 = vtanh.f32 %v157_v8 }
 0x1a0   :  { %v291_v9 = vpop.eup %290 }
 0x1a1   :  { %v137_v10 = vadd.f32 1.0, %v291_v9  ;;  %v293_v12 = vpop.eup %292 }
 0x1a2   :  { %v180_v13 = vadd.f32 1.0, %v293_v12  ;;  %v295_v14 = vpop.eup %294 }
 0x1a3   :  { %296 = vrcp.f32 %v137_v10 }
 0x1a4   :  { %298 = vrcp.f32 %v180_v13 }
 0x1ad   :  { %v297_v15 = vpop.eup %296 }
 0x1ae   :  { %v183_v16 = vmul.f32 %v297_v15, %v295_v14  ;;  %v299_v18 = vpop.eup %298 }
 0x1b0   :  { %300 = vtanh.f32 %v183_v16 }
 0x1ba   :  { %v301_v19 = vpop.eup %300 }
 0x1bb   :  { %v185_v20 = vmul.f32 %v301_v19, %v299_v18 }
 0x1bd   :  { %199 = vperm.xlu0 %287, %v185_v20   ;;  %190 = vperm.xlu1 %289, %v185_v20   ;;  %v265_v56 = vadd.f32 %v185_v20, %v347_v17 }
 0x23c   :  { %v200_v27 = vpop.permute.xlu0 %199  ;;  %v191_v28 = vpop.permute.xlu1 %190 }
 0x23d   :  { %v206_v30 = vmul.f32 %v205_v23, %v200_v27  ;;  %v249_v31 = vmul.f32 %v248_v24, %v200_v27  ;;  %v197_v33 = vmul.f32 %v196_v25, %v191_v28  ;;  %v244_v34 = vmul.f32 %v243_v26, %v191_v28 }
 0x23e   :  { %v230_v42 = vmul.f32 %v229_v36, %v200_v27  ;;  %v225_v43 = vmul.f32 %v224_v37, %v191_v28 }
 0x23f   :  { %v207_v35 = vadd.f32 %v206_v30, %v197_v33  ;;  %v250_v40 = vadd.f32 %v249_v31, %v244_v34 }
 0x240   :  { %v231_v46 = vadd.f32 %v230_v42, %v225_v43 }
 0x241   :  { %v212_v39 = vadd.f32 %v211_v32, %v207_v35  ;;  %v255_v44 = vadd.f32 %v254_v38, %v250_v40 }
 0x242   :  { %v236_v48 = vadd.f32 %v235_v45, %v231_v46 }
 0x243   :  { %v279_v41 = vmul.f32 -1.442695, %v212_v39  ;;  %v282_v47 = vmul.f32 -1.442695, %v255_v44 }
 0x245   :  { %302 = vpow2.f32 %v279_v41 }
 0x246   :  { %304 = vpow2.f32 %v282_v47 }
 0x247   :  { %306 = vtanh.f32 %v236_v48 }
 0x24f   :  { %v303_v49 = vpop.eup %302 }
 0x250   :  { %v216_v50 = vadd.f32 1.0, %v303_v49  ;;  %v305_v5 = vpop.eup %304 }
 0x251   :  { %v259_v6 = vadd.f32 1.0, %v305_v5  ;;  %v307_v51 = vpop.eup %306 }
 0x252   :  { %308 = vrcp.f32 %v216_v50 }
 0x253   :  { %310 = vrcp.f32 %v259_v6 }
 0x25c   :  { %v309_v52 = vpop.eup %308 }
 0x25d   :  { %v262_v53 = vmul.f32 %v309_v52, %v307_v51  ;;  %v311_v54 = vpop.eup %310 }
 0x25f   :  { %312 = vtanh.f32 %v262_v53 }
 0x269   :  { %v313_v55 = vpop.eup %312 }
 0x26a   :  { %v264_v11 = vmul.f32 %v313_v55, %v311_v54 }
 0x26c   :  { %v266_v57 = vadd.f32 %v265_v56, %v264_v11 }
 0x26e   :  { %268 = vst.msk [vmem:[%s402_s2] sm:$0x3f] %vm267_vm7, %v266_v57 }

</bundles_post_ra>
